<compile_context>
chip_gen: v7x
topology: tpu7x:2x2x1
jax: 0.10.0
libtpu: 0.0.40
codegen_flags: <defaults>
</compile_context>

<pallas_src>
import jax
import jax.numpy as jnp
from jax.experimental import pallas as pl
from jax.experimental.pallas import tpu as pltpu

EPS = 1e-5
LANES = 128


def _round_up(x: int, m: int) -> int:
    return (x + m - 1) // m * m


# --------------------------------------------------------------------------
# Kernel
# --------------------------------------------------------------------------
def _make_generator_kernel(layer_dims, gb_offsets, batch, n_hidden):
    """Fused kernel for n_hidden (Linear+BN+ReLU) blocks + final Linear.

    Ref order:
      x (B, in0) f32 VMEM,
      W_0..W_L  bf16 HBM (pl.ANY)     -- L = n_hidden (hidden Ws) + final W
      gb (2, total_pad) f32 VMEM      -- row0 = gammas concat, row1 = betas
      bf (1, out_pad) f32 VMEM        -- final bias (lane padded)
      out (B, out_pad) f32 VMEM
      wbuf (2, max_in, max_out) bf16 VMEM scratch (weight double-buffer)
      sem  DMA semaphores (2,)
    """
    n_layers = n_hidden + 1
    inv_b = 1.0 / float(batch)

    def kernel(*refs):
        x_ref = refs[0]
        w_refs = refs[1:1 + n_layers]
        gb_ref = refs[1 + n_layers]
        bf_ref = refs[2 + n_layers]
        out_ref = refs[3 + n_layers]
        wbuf = refs[4 + n_layers]
        sem = refs[5 + n_layers]

        def w_copy(i, slot):
            in_i, out_i = layer_dims[i]
            return pltpu.make_async_copy(
                w_refs[i], wbuf.at[slot, :in_i, :out_i], sem.at[slot])

        # Prime the pipeline: start layer 0's weight DMA immediately.
        w_copy(0, 0).start()

        h = x_ref[...]                                     # (B, in0) f32
        for i in range(n_layers):
            slot = i % 2
            # Prefetch next layer's weights while this layer computes.
            if i + 1 < n_layers:
                w_copy(i + 1, 1 - slot).start()
            w_copy(i, slot).wait()

            in_i, out_i = layer_dims[i]
            w = wbuf[slot, :in_i, :out_i]                  # bf16
            mm = jnp.dot(h.astype(jnp.bfloat16), w,
                         preferred_element_type=jnp.float32)  # (B, out_i) f32

            if i < n_hidden:
                off = gb_offsets[i]
                gamma = gb_ref[0:1, off:off + out_i]       # (1, out_i)
                beta = gb_ref[1:2, off:off + out_i]
                # Single-pass batch statistics (biased variance, train mode).
                mu = jnp.sum(mm, axis=0, keepdims=True) * inv_b
                ex2 = jnp.sum(mm * mm, axis=0, keepdims=True) * inv_b
                var = ex2 - mu * mu
                # Folded BN affine; rsqrt goes to the EUP slot.
                scale = gamma * jax.lax.rsqrt(var + EPS)
                shift = beta - mu * scale
                h = jnp.maximum(mm * scale + shift, 0.0)   # ReLU
            else:
                out_ref[...] = (mm + bf_ref[...]).astype(out_ref.dtype)

    return kernel


# --------------------------------------------------------------------------
# One-time parameter preparation (hoisted out of the forward call)
# --------------------------------------------------------------------------
def prepare_generator_params(params):
    """Pack / pad / cast parameters once; reuse across forward calls."""
    hidden = params["hidden"]
    wf, bf = params["final"]
    n_hidden = len(hidden)

    weights = []      # bf16, (in_pad, out_pad), chained
    gammas, betas = [], []
    layer_dims = []   # (in_pad, out_pad) per layer (incl. final)
    gb_offsets = []

    prev_pad = hidden[0][0].shape[0]          # input_dim (x itself is not padded)
    off = 0
    for (w, b, g, beta) in hidden:
        del b  # Linear bias before training-mode BN cancels exactly.
        in_d, out_d = w.shape
        out_pad = _round_up(out_d, LANES)
        w_p = jnp.zeros((prev_pad, out_pad), jnp.float32).at[:in_d, :out_d].set(w)
        weights.append(w_p.astype(jnp.bfloat16))
        # gamma padded with 0 so padded features are exactly 0 after BN+ReLU.
        gammas.append(jnp.zeros((1, out_pad), jnp.float32).at[:, :out_d].set(g))
        betas.append(jnp.zeros((1, out_pad), jnp.float32).at[:, :out_d].set(beta))
        layer_dims.append((prev_pad, out_pad))
        gb_offsets.append(off)
        off += out_pad
        prev_pad = out_pad

    in_d, out_d = wf.shape
    out_pad = _round_up(out_d, LANES)
    wf_p = jnp.zeros((prev_pad, out_pad), jnp.float32).at[:in_d, :out_d].set(wf)
    bf_p = jnp.zeros((1, out_pad), jnp.float32).at[:, :out_d].set(bf)
    weights.append(wf_p.astype(jnp.bfloat16))
    layer_dims.append((prev_pad, out_pad))

    gb = jnp.concatenate(
        [jnp.concatenate(gammas, axis=1), jnp.concatenate(betas, axis=1)], axis=0)

    return {
        "weights": weights,
        "gb": gb,
        "bf": bf_p,
        "layer_dims": layer_dims,
        "gb_offsets": gb_offsets,
        "n_hidden": n_hidden,
        "output_dim": out_d,
    }


def _vmem_limit_bytes(batch, input_dim, layer_dims, gb_width, out_pad):
    f32, bf16 = 4, 2
    max_in = max(d[0] for d in layer_dims)
    max_out = max(d[1] for d in layer_dims)
    b_pad = _round_up(batch, 8)
    need = (
        b_pad * input_dim * f32          # x
        + 2 * max_in * max_out * bf16    # weight double-buffer scratch
        + 8 * gb_width * f32             # gb (padded to 8 sublanes)
        + 8 * out_pad * f32              # bf
        + b_pad * out_pad * f32          # out
        + 6 * b_pad * max_out * f32      # live (B, N) f32 intermediates
    )
    return int(min(max(2 * need + (2 << 20), 4 << 20), 64 << 20))


# --------------------------------------------------------------------------
# Forward wrapper
# --------------------------------------------------------------------------
def generator_forward(x, prep):
    """Run the fused Generator forward pass as a single Pallas call."""
    batch = x.shape[0]
    layer_dims = prep["layer_dims"]
    n_layers = len(layer_dims)
    max_in = max(d[0] for d in layer_dims)
    max_out = max(d[1] for d in layer_dims)
    out_pad = layer_dims[-1][1]

    kernel = _make_generator_kernel(
        layer_dims, prep["gb_offsets"], batch, prep["n_hidden"])

    vmem_spec = pl.BlockSpec(memory_space=pltpu.MemorySpace.VMEM)
    hbm_spec = pl.BlockSpec(memory_space=pl.ANY)
    in_specs = [vmem_spec] + [hbm_spec] * n_layers + [vmem_spec, vmem_spec]

    out_padded = pl.pallas_call(
        kernel,
        out_shape=jax.ShapeDtypeStruct((batch, out_pad), jnp.float32),
        in_specs=in_specs,
        out_specs=vmem_spec,
        scratch_shapes=[
            pltpu.VMEM((2, max_in, max_out), jnp.bfloat16),
            pltpu.SemaphoreType.DMA((2,)),
        ],
        compiler_params=pltpu.CompilerParams(
            vmem_limit_bytes=_vmem_limit_bytes(
                batch, x.shape[1], layer_dims, prep["gb"].shape[1], out_pad)),
    )(x, *prep["weights"], prep["gb"], prep["bf"])

    return out_padded[:, :prep["output_dim"]]


# --------------------------------------------------------------------------
# Init + references
# --------------------------------------------------------------------------
def init_generator_params(key, input_dim, layer_sizes, output_dim):
    """Deterministic PyTorch-style init (uniform(-1/sqrt(fan_in), 1/sqrt(fan_in)))."""
    params = {"hidden": [], "final": None}
    dims = [input_dim] + list(layer_sizes)
    for i in range(len(layer_sizes)):
        fan_in, fan_out = dims[i], dims[i + 1]
        key, kw, kb = jax.random.split(key, 3)
        bound = 1.0 / jnp.sqrt(fan_in)
        w = jax.random.uniform(kw, (fan_in, fan_out), jnp.float32, -bound, bound)
        b = jax.random.uniform(kb, (1, fan_out), jnp.float32, -bound, bound)
        gamma = jnp.ones((1, fan_out), jnp.float32)
        beta = jnp.zeros((1, fan_out), jnp.float32)
        params["hidden"].append((w, b, gamma, beta))

    fan_in = layer_sizes[-1]
    key, kw, kb = jax.random.split(key, 3)
    bound = 1.0 / jnp.sqrt(fan_in)
    wf = jax.random.uniform(kw, (fan_in, output_dim), jnp.float32, -bound, bound)
    bf = jax.random.uniform(kb, (1, output_dim), jnp.float32, -bound, bound)
    params["final"] = (wf, bf)
    return params


def generator_reference(x, params, bf16_matmul=False):
    """Pure-JAX reference (PyTorch training-mode semantics, biases included).

    bf16_matmul=True mimics the kernel's bf16 MXU operands (math stays f32) to
    allow a tight correctness check; False is the exact f32 module semantics.
    """
    def dot(a, b):
        if bf16_matmul:
            a = a.astype(jnp.bfloat16)
            b = b.astype(jnp.bfloat16)
        return jnp.dot(a, b, preferred_element_type=jnp.float32)

    h = x
    for (w, b, g, beta) in params["hidden"]:
        h = dot(h, w) + b
        mean = jnp.mean(h, axis=0, keepdims=True)
        var = jnp.mean((h - mean) ** 2, axis=0, keepdims=True)
        h = (h - mean) / jnp.sqrt(var + EPS) * g + beta
        h = jnp.maximum(h, 0.0)
    wf, bf = params["final"]
    return dot(h, wf) + bf


if __name__ == "__main__":
    # Small shapes consistent with the module: Generator(input_dim=16,
    # layer_sizes=(32, 32), output_dim=8) applied to a batch of 8 vectors.
    input_dim = 16
    layer_sizes = (32, 32)
    output_dim = 8
    batch = 8

    key = jax.random.PRNGKey(0)
    key, kx = jax.random.split(key)
    x = jax.random.normal(kx, (batch, input_dim), jnp.float32)

    params = init_generator_params(key, input_dim, layer_sizes, output_dim)
    prep = prepare_generator_params(params)   # one-time prep, amortized

    out = generator_forward(x, prep)
    out = jax.block_until_ready(out)
    assert out.shape == (batch, output_dim)

    # Tight check vs. a bf16-MXU-matched reference (validates the fused BN,
    # bias cancellation, lane padding and prefetch path).
    ref_bf16 = generator_reference(x, params, bf16_matmul=True)
    assert jnp.allclose(out, ref_bf16, atol=5e-3, rtol=5e-3), "mismatch vs bf16-matched ref"

    # Loose check vs. the exact f32 PyTorch-semantics reference (bf16 MXU
    # operands introduce ~1e-2-scale differences for this depth).
    ref_f32 = generator_reference(x, params, bf16_matmul=False)
    assert jnp.allclose(out, ref_f32, atol=1e-1, rtol=1e-1), "mismatch vs f32 reference"

    print("KERNEL_OK")
</pallas_src>

<mosaic_0001>
module attributes {stable_mosaic.version = 11 : i64} {
  func.func @kernel(%arg0: memref<8x16xf32, #tpu.memory_space<vmem>>, %arg1: memref<16x128xbf16, #tpu.memory_space<any>>, %arg2: memref<128x128xbf16, #tpu.memory_space<any>>, %arg3: memref<128x128xbf16, #tpu.memory_space<any>>, %arg4: memref<2x256xf32, #tpu.memory_space<vmem>>, %arg5: memref<1x128xf32, #tpu.memory_space<vmem>>, %arg6: memref<8x128xf32, #tpu.memory_space<vmem>>, %arg7: memref<2x128x128xbf16, #tpu.memory_space<vmem>>, %arg8: memref<2x!tpu.dma_semaphore, #tpu.memory_space<semaphore_mem>>) attributes {dimension_semantics = [], scalar_prefetch = 0 : i64, scratch_operands = 2 : i64, tpu.core_type = #tpu.core_type<tc>} {
    %c0_i32 = arith.constant 0 : i32
    %c0_i32_0 = arith.constant 0 : i32
    %c0_i32_1 = arith.constant 0 : i32
    %c0_i32_2 = arith.constant 0 : i32
    %0 = tpu.memref_slice %arg7[%c0_i32, %c0_i32_1, %c0_i32_2] : memref<2x128x128xbf16, #tpu.memory_space<vmem>> -> memref<1x16x128xbf16, #tpu.memory_space<vmem>>
    %1 = tpu.memref_squeeze %0 : memref<1x16x128xbf16, #tpu.memory_space<vmem>> -> memref<16x128xbf16, #tpu.memory_space<vmem>>
    %2 = tpu.memref_slice %arg8[%c0_i32_0] : memref<2x!tpu.dma_semaphore, #tpu.memory_space<semaphore_mem>> -> memref<1x!tpu.dma_semaphore, #tpu.memory_space<semaphore_mem>>
    %3 = tpu.memref_squeeze %2 : memref<1x!tpu.dma_semaphore, #tpu.memory_space<semaphore_mem>> -> memref<!tpu.dma_semaphore, #tpu.memory_space<semaphore_mem>>
    tpu.enqueue_dma source(%arg1 : memref<16x128xbf16, #tpu.memory_space<any>>) target(%1 : memref<16x128xbf16, #tpu.memory_space<vmem>>) target_semaphore(%3 : memref<!tpu.dma_semaphore, #tpu.memory_space<semaphore_mem>>)
    %c0 = arith.constant 0 : index
    %c0_3 = arith.constant 0 : index
    %4 = vector.load %arg0[%c0, %c0_3] : memref<8x16xf32, #tpu.memory_space<vmem>>, vector<8x16xf32>
    %c1_i32 = arith.constant 1 : i32
    %c1_i32_4 = arith.constant 1 : i32
    %c0_i32_5 = arith.constant 0 : i32
    %c0_i32_6 = arith.constant 0 : i32
    %5 = tpu.memref_slice %arg7[%c1_i32, %c0_i32_5, %c0_i32_6] : memref<2x128x128xbf16, #tpu.memory_space<vmem>> -> memref<1x128x128xbf16, #tpu.memory_space<vmem>>
    %6 = tpu.memref_squeeze %5 : memref<1x128x128xbf16, #tpu.memory_space<vmem>> -> memref<128x128xbf16, #tpu.memory_space<vmem>>
    %7 = tpu.memref_slice %arg8[%c1_i32_4] : memref<2x!tpu.dma_semaphore, #tpu.memory_space<semaphore_mem>> -> memref<1x!tpu.dma_semaphore, #tpu.memory_space<semaphore_mem>>
    %8 = tpu.memref_squeeze %7 : memref<1x!tpu.dma_semaphore, #tpu.memory_space<semaphore_mem>> -> memref<!tpu.dma_semaphore, #tpu.memory_space<semaphore_mem>>
    tpu.enqueue_dma source(%arg2 : memref<128x128xbf16, #tpu.memory_space<any>>) target(%6 : memref<128x128xbf16, #tpu.memory_space<vmem>>) target_semaphore(%8 : memref<!tpu.dma_semaphore, #tpu.memory_space<semaphore_mem>>)
    %c0_i32_7 = arith.constant 0 : i32
    %c0_i32_8 = arith.constant 0 : i32
    %c0_i32_9 = arith.constant 0 : i32
    %c0_i32_10 = arith.constant 0 : i32
    %9 = tpu.memref_slice %arg7[%c0_i32_7, %c0_i32_9, %c0_i32_10] : memref<2x128x128xbf16, #tpu.memory_space<vmem>> -> memref<1x16x128xbf16, #tpu.memory_space<vmem>>
    %10 = tpu.memref_squeeze %9 : memref<1x16x128xbf16, #tpu.memory_space<vmem>> -> memref<16x128xbf16, #tpu.memory_space<vmem>>
    %11 = tpu.memref_slice %arg8[%c0_i32_8] : memref<2x!tpu.dma_semaphore, #tpu.memory_space<semaphore_mem>> -> memref<1x!tpu.dma_semaphore, #tpu.memory_space<semaphore_mem>>
    %12 = tpu.memref_squeeze %11 : memref<1x!tpu.dma_semaphore, #tpu.memory_space<semaphore_mem>> -> memref<!tpu.dma_semaphore, #tpu.memory_space<semaphore_mem>>
    tpu.wait_dma2 semaphore(%12 : memref<!tpu.dma_semaphore, #tpu.memory_space<semaphore_mem>>) src(%arg1 : memref<16x128xbf16, #tpu.memory_space<any>>) dst(%10 : memref<16x128xbf16, #tpu.memory_space<vmem>>)
    %c0_11 = arith.constant 0 : index
    %c0_12 = arith.constant 0 : index
    %c0_13 = arith.constant 0 : index
    %13 = vector.load %arg7[%c0_11, %c0_12, %c0_13] : memref<2x128x128xbf16, #tpu.memory_space<vmem>>, vector<1x16x128xbf16>
    %14 = vector.shape_cast %13 : vector<1x16x128xbf16> to vector<16x128xbf16>
    %15 = arith.truncf %4 : vector<8x16xf32> to vector<8x16xbf16>
    %cst = arith.constant dense<0.000000e+00> : vector<8x128xf32>
    %16 = tpu.matmul %15, %14, %cst {dimension_numbers = #tpu.dot_dimension_numbers<[1], [0], [0], [1], [0, 0, 1, 1], [], []>} : vector<8x16xbf16>, vector<16x128xbf16>, vector<8x128xf32> -> vector<8x128xf32>
    %c0_14 = arith.constant 0 : index
    %c0_15 = arith.constant 0 : index
    %17 = vector.load %arg4[%c0_14, %c0_15] : memref<2x256xf32, #tpu.memory_space<vmem>>, vector<1x128xf32>
    %c1 = arith.constant 1 : index
    %c0_16 = arith.constant 0 : index
    %18 = vector.load %arg4[%c1, %c0_16] : memref<2x256xf32, #tpu.memory_space<vmem>>, vector<1x128xf32>
    %cst_17 = arith.constant dense<0.000000e+00> : vector<128xf32>
    %19 = vector.multi_reduction <add>, %16, %cst_17 [0] : vector<8x128xf32> to vector<128xf32>
    %20 = vector.shape_cast %19 : vector<128xf32> to vector<1x128xf32>
    %cst_18 = arith.constant 1.250000e-01 : f32
    %21 = vector.broadcast %cst_18 : f32 to vector<1x128xf32>
    %22 = arith.mulf %20, %21 : vector<1x128xf32>
    %23 = arith.mulf %16, %16 : vector<8x128xf32>
    %cst_19 = arith.constant dense<0.000000e+00> : vector<128xf32>
    %24 = vector.multi_reduction <add>, %23, %cst_19 [0] : vector<8x128xf32> to vector<128xf32>
    %25 = vector.shape_cast %24 : vector<128xf32> to vector<1x128xf32>
    %cst_20 = arith.constant 1.250000e-01 : f32
    %26 = vector.broadcast %cst_20 : f32 to vector<1x128xf32>
    %27 = arith.mulf %25, %26 : vector<1x128xf32>
    %28 = arith.mulf %22, %22 : vector<1x128xf32>
    %29 = arith.subf %27, %28 : vector<1x128xf32>
    %cst_21 = arith.constant 9.99999974E-6 : f32
    %30 = vector.broadcast %cst_21 : f32 to vector<1x128xf32>
    %31 = arith.addf %29, %30 : vector<1x128xf32>
    %32 = math.rsqrt %31 : vector<1x128xf32>
    %33 = arith.mulf %17, %32 : vector<1x128xf32>
    %34 = arith.mulf %22, %33 : vector<1x128xf32>
    %35 = arith.subf %18, %34 : vector<1x128xf32>
    %36 = vector.broadcast %33 : vector<1x128xf32> to vector<8x128xf32>
    %37 = arith.mulf %16, %36 : vector<8x128xf32>
    %38 = vector.broadcast %35 : vector<1x128xf32> to vector<8x128xf32>
    %39 = arith.addf %37, %38 : vector<8x128xf32>
    %cst_22 = arith.constant 0.000000e+00 : f32
    %40 = vector.broadcast %cst_22 : f32 to vector<8x128xf32>
    %41 = arith.maximumf %39, %40 : vector<8x128xf32>
    %c0_i32_23 = arith.constant 0 : i32
    %c0_i32_24 = arith.constant 0 : i32
    %c0_i32_25 = arith.constant 0 : i32
    %c0_i32_26 = arith.constant 0 : i32
    %42 = tpu.memref_slice %arg7[%c0_i32_23, %c0_i32_25, %c0_i32_26] : memref<2x128x128xbf16, #tpu.memory_space<vmem>> -> memref<1x128x128xbf16, #tpu.memory_space<vmem>>
    %43 = tpu.memref_squeeze %42 : memref<1x128x128xbf16, #tpu.memory_space<vmem>> -> memref<128x128xbf16, #tpu.memory_space<vmem>>
    %44 = tpu.memref_slice %arg8[%c0_i32_24] : memref<2x!tpu.dma_semaphore, #tpu.memory_space<semaphore_mem>> -> memref<1x!tpu.dma_semaphore, #tpu.memory_space<semaphore_mem>>
    %45 = tpu.memref_squeeze %44 : memref<1x!tpu.dma_semaphore, #tpu.memory_space<semaphore_mem>> -> memref<!tpu.dma_semaphore, #tpu.memory_space<semaphore_mem>>
    tpu.enqueue_dma source(%arg3 : memref<128x128xbf16, #tpu.memory_space<any>>) target(%43 : memref<128x128xbf16, #tpu.memory_space<vmem>>) target_semaphore(%45 : memref<!tpu.dma_semaphore, #tpu.memory_space<semaphore_mem>>)
    %c1_i32_27 = arith.constant 1 : i32
    %c1_i32_28 = arith.constant 1 : i32
    %c0_i32_29 = arith.constant 0 : i32
    %c0_i32_30 = arith.constant 0 : i32
    %46 = tpu.memref_slice %arg7[%c1_i32_27, %c0_i32_29, %c0_i32_30] : memref<2x128x128xbf16, #tpu.memory_space<vmem>> -> memref<1x128x128xbf16, #tpu.memory_space<vmem>>
    %47 = tpu.memref_squeeze %46 : memref<1x128x128xbf16, #tpu.memory_space<vmem>> -> memref<128x128xbf16, #tpu.memory_space<vmem>>
    %48 = tpu.memref_slice %arg8[%c1_i32_28] : memref<2x!tpu.dma_semaphore, #tpu.memory_space<semaphore_mem>> -> memref<1x!tpu.dma_semaphore, #tpu.memory_space<semaphore_mem>>
    %49 = tpu.memref_squeeze %48 : memref<1x!tpu.dma_semaphore, #tpu.memory_space<semaphore_mem>> -> memref<!tpu.dma_semaphore, #tpu.memory_space<semaphore_mem>>
    tpu.wait_dma2 semaphore(%49 : memref<!tpu.dma_semaphore, #tpu.memory_space<semaphore_mem>>) src(%arg2 : memref<128x128xbf16, #tpu.memory_space<any>>) dst(%47 : memref<128x128xbf16, #tpu.memory_space<vmem>>)
    %c1_31 = arith.constant 1 : index
    %c0_32 = arith.constant 0 : index
    %c0_33 = arith.constant 0 : index
    %50 = vector.load %arg7[%c1_31, %c0_32, %c0_33] : memref<2x128x128xbf16, #tpu.memory_space<vmem>>, vector<1x128x128xbf16>
    %51 = vector.shape_cast %50 : vector<1x128x128xbf16> to vector<128x128xbf16>
    %52 = arith.truncf %41 : vector<8x128xf32> to vector<8x128xbf16>
    %cst_34 = arith.constant dense<0.000000e+00> : vector<8x128xf32>
    %53 = tpu.matmul %52, %51, %cst_34 {dimension_numbers = #tpu.dot_dimension_numbers<[1], [0], [0], [1], [0, 0, 1, 1], [], []>} : vector<8x128xbf16>, vector<128x128xbf16>, vector<8x128xf32> -> vector<8x128xf32>
    %c0_35 = arith.constant 0 : index
    %c128 = arith.constant 128 : index
    %54 = vector.load %arg4[%c0_35, %c128] : memref<2x256xf32, #tpu.memory_space<vmem>>, vector<1x128xf32>
    %c1_36 = arith.constant 1 : index
    %c128_37 = arith.constant 128 : index
    %55 = vector.load %arg4[%c1_36, %c128_37] : memref<2x256xf32, #tpu.memory_space<vmem>>, vector<1x128xf32>
    %cst_38 = arith.constant dense<0.000000e+00> : vector<128xf32>
    %56 = vector.multi_reduction <add>, %53, %cst_38 [0] : vector<8x128xf32> to vector<128xf32>
    %57 = vector.shape_cast %56 : vector<128xf32> to vector<1x128xf32>
    %cst_39 = arith.constant 1.250000e-01 : f32
    %58 = vector.broadcast %cst_39 : f32 to vector<1x128xf32>
    %59 = arith.mulf %57, %58 : vector<1x128xf32>
    %60 = arith.mulf %53, %53 : vector<8x128xf32>
    %cst_40 = arith.constant dense<0.000000e+00> : vector<128xf32>
    %61 = vector.multi_reduction <add>, %60, %cst_40 [0] : vector<8x128xf32> to vector<128xf32>
    %62 = vector.shape_cast %61 : vector<128xf32> to vector<1x128xf32>
    %cst_41 = arith.constant 1.250000e-01 : f32
    %63 = vector.broadcast %cst_41 : f32 to vector<1x128xf32>
    %64 = arith.mulf %62, %63 : vector<1x128xf32>
    %65 = arith.mulf %59, %59 : vector<1x128xf32>
    %66 = arith.subf %64, %65 : vector<1x128xf32>
    %cst_42 = arith.constant 9.99999974E-6 : f32
    %67 = vector.broadcast %cst_42 : f32 to vector<1x128xf32>
    %68 = arith.addf %66, %67 : vector<1x128xf32>
    %69 = math.rsqrt %68 : vector<1x128xf32>
    %70 = arith.mulf %54, %69 : vector<1x128xf32>
    %71 = arith.mulf %59, %70 : vector<1x128xf32>
    %72 = arith.subf %55, %71 : vector<1x128xf32>
    %73 = vector.broadcast %70 : vector<1x128xf32> to vector<8x128xf32>
    %74 = arith.mulf %53, %73 : vector<8x128xf32>
    %75 = vector.broadcast %72 : vector<1x128xf32> to vector<8x128xf32>
    %76 = arith.addf %74, %75 : vector<8x128xf32>
    %cst_43 = arith.constant 0.000000e+00 : f32
    %77 = vector.broadcast %cst_43 : f32 to vector<8x128xf32>
    %78 = arith.maximumf %76, %77 : vector<8x128xf32>
    %c0_i32_44 = arith.constant 0 : i32
    %c0_i32_45 = arith.constant 0 : i32
    %c0_i32_46 = arith.constant 0 : i32
    %c0_i32_47 = arith.constant 0 : i32
    %79 = tpu.memref_slice %arg7[%c0_i32_44, %c0_i32_46, %c0_i32_47] : memref<2x128x128xbf16, #tpu.memory_space<vmem>> -> memref<1x128x128xbf16, #tpu.memory_space<vmem>>
    %80 = tpu.memref_squeeze %79 : memref<1x128x128xbf16, #tpu.memory_space<vmem>> -> memref<128x128xbf16, #tpu.memory_space<vmem>>
    %81 = tpu.memref_slice %arg8[%c0_i32_45] : memref<2x!tpu.dma_semaphore, #tpu.memory_space<semaphore_mem>> -> memref<1x!tpu.dma_semaphore, #tpu.memory_space<semaphore_mem>>
    %82 = tpu.memref_squeeze %81 : memref<1x!tpu.dma_semaphore, #tpu.memory_space<semaphore_mem>> -> memref<!tpu.dma_semaphore, #tpu.memory_space<semaphore_mem>>
    tpu.wait_dma2 semaphore(%82 : memref<!tpu.dma_semaphore, #tpu.memory_space<semaphore_mem>>) src(%arg3 : memref<128x128xbf16, #tpu.memory_space<any>>) dst(%80 : memref<128x128xbf16, #tpu.memory_space<vmem>>)
    %c0_48 = arith.constant 0 : index
    %c0_49 = arith.constant 0 : index
    %c0_50 = arith.constant 0 : index
    %83 = vector.load %arg7[%c0_48, %c0_49, %c0_50] : memref<2x128x128xbf16, #tpu.memory_space<vmem>>, vector<1x128x128xbf16>
    %84 = vector.shape_cast %83 : vector<1x128x128xbf16> to vector<128x128xbf16>
    %85 = arith.truncf %78 : vector<8x128xf32> to vector<8x128xbf16>
    %cst_51 = arith.constant dense<0.000000e+00> : vector<8x128xf32>
    %86 = tpu.matmul %85, %84, %cst_51 {dimension_numbers = #tpu.dot_dimension_numbers<[1], [0], [0], [1], [0, 0, 1, 1], [], []>} : vector<8x128xbf16>, vector<128x128xbf16>, vector<8x128xf32> -> vector<8x128xf32>
    %c0_52 = arith.constant 0 : index
    %c0_53 = arith.constant 0 : index
    %87 = vector.load %arg5[%c0_52, %c0_53] : memref<1x128xf32, #tpu.memory_space<vmem>>, vector<1x128xf32>
    %88 = vector.broadcast %87 : vector<1x128xf32> to vector<8x128xf32>
    %89 = arith.addf %86, %88 : vector<8x128xf32>
    %c0_54 = arith.constant 0 : index
    %c0_55 = arith.constant 0 : index
    %90 = vector.load %arg6[%c0_54, %c0_55] : memref<8x128xf32, #tpu.memory_space<vmem>>, vector<8x128xf32>
    tpu.vector_store %arg6[%c0_54, %c0_55], %89 {strides = array<i32>} : memref<8x128xf32, #tpu.memory_space<vmem>>, vector<8x128xf32>,
    return
  }
}

</mosaic_0001>

<bundles_post_ra>
// kernel: tpu_custom_call.1
= control target key start
LH: loop header
LB: loop body
LE: loop exit
PB: predicated region body
PF: predicated region fallthrough
CT: control target
= control target key end

     0   :  { %11 = vsyncpa [#allocation5], 0  ;;  %s695_s0 = inlined_call_operand.hbm [shape: f32[8,16], index: 0, kind: input, shape index: {}]   ;;  %s696_s1 = inlined_call_operand.hbm [shape: bf16[16,128], index: 1, kind: input, shape index: {}]   ;;  %s697_s2 = inlined_call_operand.hbm [shape: bf16[128,128], index: 2, kind: input, shape index: {}]   ;;  %s698_s3 = inlined_call_operand.hbm [shape: bf16[128,128], index: 3, kind: input, shape index: {}]   ;;  %s699_s4 = inlined_call_operand.vmem [shape: f32[2,256], index: 4, kind: input, shape index: {}]   ;;  %s700_s5 = inlined_call_operand.vmem [shape: f32[1,128], index: 5, kind: input, shape index: {}]   ;;  %s701_s6 = inlined_call_operand.hbm [shape: f32[8,128], index: 6, kind: output, shape index: {}]  }
   0x1   :  { %12 = vsyncpa [#allocation6], 0  ;;  %s527_s21 = smov [#allocation4]   ;;  %s407_s25 = scalar_lea.hbm %s695_s0, 128 }
   0x2   :  { %s19_s22 = sshll.u32 %s527_s21, 4  ;;  %p408_p0 = scmp.ne.s32.totalorder %s695_s0, %s407_s25  ;;  %s20_s22 = int_to_ptr.vmem [resolvable:$true] %s19_s22 }
   0x3   :  { %p411_p1 = scmp.lt.u32.totalorder %s407_s25, %s695_s0 }
   0x5   :  { %p413_p2 = pnand %p411_p1, %p408_p0 }
   0x7   :  { %416 = shalt.err (!%p413_p2)
}
   0x8   :  { %s417_s30 = scalar_lea.vmem %s20_s22, 128  ;;  %p422_p4 = scmp.lt.s32.totalorder %s20_s22, %s20_s22 }
   0x9   :  { %p418_p3 = scmp.ne.s32.totalorder %s20_s22, %s417_s30  ;;  %p423_p5 = scmp.lt.s32.totalorder %s417_s30, %s417_s30 }
   0xb   :  { %p424_p6 = por %p423_p5, %p422_p4 }
   0xd   :  { %p425_p7 = pnand %p424_p6, %p418_p3 }
   0xf   :  { %428 = shalt.err (!%p425_p7)
}
  0x10   :  { %22 = dma.hbm_to_vmem [thread:$0]  %s695_s0, 128, %s20_s22, [#allocation5]  }
  0x11   :  { %517 = dma.done.wait [#allocation5], 128  }
  0x12   :  { %518 = vsyncadd [#allocation5], 4294967168  ;;  %s528_s9 = smov [#allocation2]   ;;  %s529_s11 = smov [#allocation2 + $0x40]  }
  0x13   :  { %s38_s10 = sshll.u32 %s528_s9, 4  ;;  %s52_s12 = sshll.u32 %s529_s11, 4  ;;  %s580_s10 = int_to_ptr.vmem [resolvable:$true] %s38_s10  ;;  %s53_s12 = int_to_ptr.vmem [resolvable:$true] %s52_s12 }
  0x14   :  { %s429_s15 = scalar_lea.hbm %s696_s1, 128 }
  0x15   :  { %p430_p8 = scmp.ne.s32.totalorder %s696_s1, %s429_s15  ;;  %p433_p9 = scmp.lt.u32.totalorder %s429_s15, %s696_s1 }
  0x17   :  { %p435_p10 = pnand %p433_p9, %p430_p8 }
  0x19   :  { %438 = shalt.err (!%p435_p10)  }
  0x1a   :  { %s439_s0 = scalar_lea.vmem %s580_s10, 128  ;;  %s594_s20 = scalar_lea.vmem %s580_s10, 2048 }
  0x1b   :  { %p440_p11 = scmp.ne.s32.totalorder %s580_s10, %s439_s0  ;;  %p444_p12 = scmp.lt.s32.totalorder %s580_s10, %s580_s10 }
  0x1c   :  { %p445_p13 = scmp.lt.s32.totalorder %s594_s20, %s439_s0 }
  0x1e   :  { %p446_p0 = por %p445_p13, %p444_p12 }
  0x20   :  { %p447_p1 = pnand %p446_p0, %p440_p11 }
  0x22   :  { %450 = shalt.err (!%p447_p1)  }
  0x23   :  { %41 = dma.hbm_to_vmem [thread:$0]  %s696_s1, 128, %s580_s10, [#allocation3] }
  0x24   :  { %s451_s25 = scalar_lea.hbm %s697_s2, 1024 }
  0x25   :  { %p452_p2 = scmp.ne.s32.totalorder %s697_s2, %s451_s25  ;;  %p455_p3 = scmp.lt.u32.totalorder %s451_s25, %s697_s2 }
  0x27   :  { %p457_p4 = pnand %p455_p3, %p452_p2 }
  0x29   :  { %460 = shalt.err (!%p457_p4)  }
  0x2a   :  { %s461_s30 = scalar_lea.vmem %s53_s12, 1024  ;;  %p466_p6 = scmp.lt.s32.totalorder %s53_s12, %s580_s10 }
  0x2b   :  { %p462_p5 = scmp.ne.s32.totalorder %s53_s12, %s461_s30  ;;  %p467_p7 = scmp.lt.s32.totalorder %s594_s20, %s461_s30 }
  0x2d   :  { %p468_p8 = por %p467_p7, %p466_p6 }
  0x2f   :  { %p469_p9 = pnand %p468_p8, %p462_p5 }
  0x31   :  { %472 = shalt.err (!%p469_p9)  }
  0x32   :  { %55 = dma.hbm_to_vmem [thread:$0]  %s697_s2, 1024, %s53_s12, [#allocation3 + $0x1]  ;;  %v42_v0 = vld [vmem:[#allocation4] sm:$0xff] }
  0x33   :  { %519 = dma.done.wait [#allocation3], 128 }
  0x34   :  { %520 = vsyncadd [#allocation3], 4294967168  ;;  %v530_v1 = vmov 0.0   ;;  %vm531_vm0 = vmmov 0   ;;  %v60_v2 = vld [vmem:[#allocation2] sm:$0xff]  ;;  %v61_v3 = vpack.c.bf16 %v42_v0, %v42_v0  ;;  %vm62_vm1 = vcmask 130048  }
  0x35   :  { %351 = vmatprep.subr.bf16.mxu0 %v530_v1  ;;  %353 = vmatprep.mubr.msk.bf16.mxu0 %vm531_vm0, %v530_v1  ;;  %s473_s11 = scalar_lea.hbm %s698_s3, 1024 }
  0x36   :  { %352 = vmatpush3.bf16.msra.mxu0 %v60_v2  ;;  %p474_p10 = scmp.ne.s32.totalorder %s698_s3, %s473_s11  ;;  %p477_p11 = scmp.lt.u32.totalorder %s473_s11, %s698_s3 }
  0x38   :  { %p479_p13 = pnand %p477_p11, %p474_p10 }
  0x3a   :  { %482 = shalt.err (!%p479_p13)  }
  0x3b   :  { %s483_s15 = scalar_lea.vmem %s580_s10, 1024 }
  0x3c   :  { %p484_p0 = scmp.ne.s32.totalorder %s580_s10, %s483_s15  ;;  %p489_p1 = scmp.lt.s32.totalorder %s594_s20, %s483_s15 }
  0x3e   :  { %p490_p2 = por %p489_p1, %p444_p12 }
  0x40   :  { %p491_p3 = pnand %p490_p2, %p484_p0 }
  0x42   :  { %494 = shalt.err (!%p491_p3)  }
  0x43   :  { %151 = dma.hbm_to_vmem [thread:$0]  %s698_s3, 1024, %s580_s10, [#allocation3]  ;;  %354 = vmatmul.mubr.msk.bf16.vlgmr.msra.gmra.mrb[0].mxu0 %vm62_vm1, %v61_v3  ;;  %v130_v26 = vlaneseq  ;;  %v106_v28 = vld [vmem:[%s699_s4] sm:$0x1]  ;;  %v107_v32 = vld [vmem:[%s699_s4 + $0x1] sm:$0x1] }
  0x45   :  { %v131_v27 = vshrl.u32 %v130_v26, 7 }
  0x47   :  { %v645_v29 = vsub.s32 0, %v131_v27 }
 0x116   :  { %v100_v4 = vpop.f32.mrb[0].mxu0 }
 0x117   :  { %v108_v5 = vrot.slane %v100_v4, 4  ;;  %v115_v6 = vmul.f32 %v100_v4, %v100_v4  ;;  %v355_v7 = vpop.f32.mrb[1].mxu0 }
 0x118   :  { %v103_v8 = vpop.f32.mrb[2].mxu0 }
 0x119   :  { %v109_v9 = vadd.f32 %v108_v5, %v100_v4  ;;  %v116_v10 = vrot.slane %v115_v6, 4  ;;  %v356_v11 = vpop.f32.mrb[3].mxu0 }
 0x11b   :  { %v110_v12 = vrot.slane %v109_v9, 2  ;;  %v117_v13 = vadd.f32 %v116_v10, %v115_v6 }
 0x11d   :  { %v111_v14 = vadd.f32 %v110_v12, %v109_v9  ;;  %v118_v15 = vrot.slane %v117_v13, 2 }
 0x11f   :  { %v112_v16 = vrot.slane %v111_v14, 1  ;;  %v119_v17 = vadd.f32 %v118_v15, %v117_v13 }
 0x121   :  { %v113_v18 = vadd.f32 %v112_v16, %v111_v14  ;;  %v120_v19 = vrot.slane %v119_v17, 1 }
 0x123   :  { %v114_v20 = vmul.f32 0.125, %v113_v18  ;;  %v121_v21 = vadd.f32 %v120_v19, %v119_v17 }
 0x125   :  { %v122_v22 = vmul.f32 0.125, %v121_v21  ;;  %v123_v23 = vmul.f32 %v114_v20, %v114_v20 }
 0x127   :  { %v124_v24 = vsub.f32 %v122_v22, %v123_v23 }
 0x129   :  { %v125_v25 = vadd.f32 1e-05, %v124_v24 }
 0x12b   :  { %403 = vrsqrt.f32 %v125_v25 }
 0x135   :  { %v404_v30 = vpop.eup %403 }
 0x136   :  { %v127_v31 = vmul.f32 %v404_v30, %v106_v28 }
 0x138   :  { %v128_v33 = vmul.f32 %v127_v31, %v114_v20  ;;  %v133_v34 = vrot.slane %v127_v31, %v645_v29 }
 0x13a   :  { %v129_v35 = vsub.f32 %v107_v32, %v128_v33  ;;  %v134_v36 = vmul.f32 %v133_v34, %v100_v4 }
 0x13c   :  { %v138_v37 = vrot.slane %v129_v35, %v645_v29 }
 0x13e   :  { %v139_v38 = vadd.f32 %v138_v37, %v134_v36 }
 0x140   :  { %v140_v39 = vmax.f32 %v139_v38, 0.0 }
 0x141   :  { %521 = dma.done.wait [#allocation3 + $0x1], 1024 }
 0x142   :  { %522 = vsyncadd [#allocation3 + $0x1], 4294966272  ;;  %357 = vmatprep.subr.bf16.mxu1 %v530_v1  ;;  %373 = vmatprep.mubr.msk.bf16.mxu1 %vm531_vm0, %v530_v1  ;;  %v156_v40 = vld [vmem:[#allocation2 + $0x40] sm:$0xff]  ;;  %v157_v41 = vld [vmem:[#allocation2 + $0x48] sm:$0xff]  ;;  %v164_v48 = vpack.c.bf16 %v140_v39, %v140_v39 }
 0x143   :  { %358 = vmatpush3.bf16.msra.mxu1 %v156_v40  ;;  %v158_v42 = vld [vmem:[#allocation2 + $0x50] sm:$0xff]  ;;  %v159_v43 = vld [vmem:[#allocation2 + $0x58] sm:$0xff]  ;;  %v160_v44 = vld [vmem:[#allocation2 + $0x60] sm:$0xff] }
 0x144   :  { %359 = vmatprep.subr.bf16.mxu1 %v530_v1  ;;  %v161_v45 = vld [vmem:[#allocation2 + $0x68] sm:$0xff]  ;;  %v162_v46 = vld [vmem:[#allocation2 + $0x70] sm:$0xff]  ;;  %v163_v47 = vld [vmem:[#allocation2 + $0x78] sm:$0xff] }
 0x145   :  { %v205_v8 = vld [vmem:[%s699_s4 + $0x2] sm:$0x1]  ;;  %v206_v11 = vld [vmem:[%s699_s4 + $0x3] sm:$0x1] }
 0x147   :  { %360 = vmatpush3.bf16.msra.mxu1 %v157_v41 }
 0x148   :  { %361 = vmatprep.subr.bf16.mxu1 %v530_v1 }
 0x14b   :  { %362 = vmatpush3.bf16.msra.mxu1 %v158_v42 }
 0x14c   :  { %363 = vmatprep.subr.bf16.mxu1 %v530_v1 }
 0x14f   :  { %364 = vmatpush3.bf16.msra.mxu1 %v159_v43 }
 0x150   :  { %365 = vmatprep.subr.bf16.mxu1 %v530_v1 }
 0x153   :  { %366 = vmatpush3.bf16.msra.mxu1 %v160_v44 }
 0x154   :  { %367 = vmatprep.subr.bf16.mxu1 %v530_v1 }
 0x157   :  { %368 = vmatpush3.bf16.msra.mxu1 %v161_v45 }
 0x158   :  { %369 = vmatprep.subr.bf16.mxu1 %v530_v1 }
 0x15b   :  { %370 = vmatpush3.bf16.msra.mxu1 %v162_v46 }
 0x15c   :  { %371 = vmatprep.subr.bf16.mxu1 %v530_v1 }
 0x15f   :  { %372 = vmatpush3.bf16.msra.mxu1 %v163_v47 }
 0x162   :  { %374 = vmatmul.mubr.bf16.vlgmr.msra.gmra.mrb[0].mxu1 %v164_v48 }
 0x235   :  { %v199_v49 = vpop.f32.mrb[0].mxu1 }
 0x236   :  { %v207_v50 = vrot.slane %v199_v49, 4  ;;  %v214_v51 = vmul.f32 %v199_v49, %v199_v49  ;;  %v375_v52 = vpop.f32.mrb[1].mxu1 }
 0x237   :  { %v202_v53 = vpop.f32.mrb[2].mxu1 }
 0x238   :  { %v208_v54 = vadd.f32 %v207_v50, %v199_v49  ;;  %v215_v55 = vrot.slane %v214_v51, 4  ;;  %v376_v56 = vpop.f32.mrb[3].mxu1 }
 0x23a   :  { %v209_v57 = vrot.slane %v208_v54, 2  ;;  %v216_v58 = vadd.f32 %v215_v55, %v214_v51 }
 0x23c   :  { %v210_v59 = vadd.f32 %v209_v57, %v208_v54  ;;  %v217_v60 = vrot.slane %v216_v58, 2 }
 0x23e   :  { %v211_v61 = vrot.slane %v210_v59, 1  ;;  %v218_v62 = vadd.f32 %v217_v60, %v216_v58 }
 0x240   :  { %v212_v63 = vadd.f32 %v211_v61, %v210_v59  ;;  %v219_v0 = vrot.slane %v218_v62, 1 }
 0x242   :  { %v213_v2 = vmul.f32 0.125, %v212_v63  ;;  %v220_v3 = vadd.f32 %v219_v0, %v218_v62 }
 0x244   :  { %v221_v4 = vmul.f32 0.125, %v220_v3  ;;  %v222_v5 = vmul.f32 %v213_v2, %v213_v2 }
 0x246   :  { %v223_v6 = vsub.f32 %v221_v4, %v222_v5 }
 0x248   :  { %v224_v7 = vadd.f32 1e-05, %v223_v6 }
 0x24a   :  { %405 = vrsqrt.f32 %v224_v7 }
 0x254   :  { %v406_v9 = vpop.eup %405 }
 0x255   :  { %v226_v10 = vmul.f32 %v406_v9, %v205_v8 }
 0x257   :  { %v227_v12 = vmul.f32 %v226_v10, %v213_v2  ;;  %v232_v13 = vrot.slane %v226_v10, %v645_v29 }
 0x259   :  { %v228_v14 = vsub.f32 %v206_v11, %v227_v12  ;;  %v233_v15 = vmul.f32 %v232_v13, %v199_v49 }
 0x25b   :  { %v237_v16 = vrot.slane %v228_v14, %v645_v29 }
 0x25d   :  { %v238_v17 = vadd.f32 %v237_v16, %v233_v15 }
 0x25f   :  { %v239_v18 = vmax.f32 %v238_v17, 0.0 }
 0x260   :  { %523 = dma.done.wait [#allocation3], 1024 }
 0x261   :  { %524 = vsyncadd [#allocation3], 4294966272  ;;  %377 = vmatprep.subr.bf16.mxu0 %v530_v1  ;;  %393 = vmatprep.mubr.msk.bf16.mxu0 %vm531_vm0, %v530_v1  ;;  %v242_v19 = vld [vmem:[#allocation2] sm:$0xff]  ;;  %v243_v20 = vld [vmem:[#allocation2 + $0x8] sm:$0xff]  ;;  %v250_v27 = vpack.c.bf16 %v239_v18, %v239_v18  ;;  %s532_s24 = smov [#allocation7]  }
 0x262   :  { %378 = vmatpush3.bf16.msra.mxu0 %v242_v19  ;;  %v244_v21 = vld [vmem:[#allocation2 + $0x10] sm:$0xff]  ;;  %v245_v22 = vld [vmem:[#allocation2 + $0x18] sm:$0xff]  ;;  %v246_v23 = vld [vmem:[#allocation2 + $0x20] sm:$0xff]  ;;  %s305_s25 = sshll.u32 %s532_s24, 4  ;;  %s306_s25 = int_to_ptr.vmem [resolvable:$true] %s305_s25 }
 0x263   :  { %379 = vmatprep.subr.bf16.mxu0 %v530_v1  ;;  %v247_v24 = vld [vmem:[#allocation2 + $0x28] sm:$0xff]  ;;  %v248_v25 = vld [vmem:[#allocation2 + $0x30] sm:$0xff]  ;;  %v249_v26 = vld [vmem:[#allocation2 + $0x38] sm:$0xff]  ;;  %s495_s26 = scalar_lea.vmem %s306_s25, 128  ;;  %p500_p4 = scmp.lt.s32.totalorder %s306_s25, %s306_s25 }
 0x264   :  { %v328_v28 = vld [vmem:[%s700_s5] ss:$0 sm:$0xff]  ;;  %p496_p12 = scmp.ne.s32.totalorder %s306_s25, %s495_s26  ;;  %p501_p5 = scmp.lt.s32.totalorder %s495_s26, %s495_s26 }
 0x266   :  { %380 = vmatpush3.bf16.msra.mxu0 %v243_v20  ;;  %p502_p6 = por %p501_p5, %p500_p4 }
 0x267   :  { %381 = vmatprep.subr.bf16.mxu0 %v530_v1 }
 0x268   :  { %p503_p7 = pnand %p502_p6, %p496_p12 }
 0x26a   :  { %382 = vmatpush3.bf16.msra.mxu0 %v244_v21 }
 0x26b   :  { %383 = vmatprep.subr.bf16.mxu0 %v530_v1 }
 0x26e   :  { %384 = vmatpush3.bf16.msra.mxu0 %v245_v22 }
 0x26f   :  { %385 = vmatprep.subr.bf16.mxu0 %v530_v1 }
 0x272   :  { %386 = vmatpush3.bf16.msra.mxu0 %v246_v23 }
 0x273   :  { %387 = vmatprep.subr.bf16.mxu0 %v530_v1 }
 0x276   :  { %388 = vmatpush3.bf16.msra.mxu0 %v247_v24 }
 0x277   :  { %389 = vmatprep.subr.bf16.mxu0 %v530_v1 }
 0x27a   :  { %390 = vmatpush3.bf16.msra.mxu0 %v248_v25 }
 0x27b   :  { %391 = vmatprep.subr.bf16.mxu0 %v530_v1 }
 0x27e   :  { %392 = vmatpush3.bf16.msra.mxu0 %v249_v26 }
 0x281   :  { %394 = vmatmul.mubr.bf16.vlgmr.msra.gmra.mrb[4].mxu0 %v250_v27 }
 0x354   :  { %v292_v29 = vpop.f32.mrb[4].mxu0 }
 0x355   :  { %v293_v30 = vadd.f32 %v328_v28, %v292_v29  ;;  %v395_v31 = vpop.f32.mrb[5].mxu0 }
 0x356   :  { %v295_v32 = vpop.f32.mrb[6].mxu0 }
 0x357   :  { %298 = vst [vmem:[#allocation7] sm:$0xff] %v293_v30  ;;  %v396_v33 = vpop.f32.mrb[7].mxu0 }
 0x358   :  { %506 = shalt.err (!%p503_p7)
}
 0x359   :  { %s507_s5 = scalar_lea.hbm %s701_s6, 128 }
 0x35a   :  { %p508_p8 = scmp.ne.s32.totalorder %s701_s6, %s507_s5  ;;  %p511_p9 = scmp.lt.u32.totalorder %s507_s5, %s701_s6 }
 0x35c   :  { %p513_p10 = pnand %p511_p9, %p508_p8 }
 0x35e   :  { %516 = shalt.err (!%p513_p10)
}
 0x35f   :  { %308 = dma.vmem_to_hbm [thread:$0]  %s306_s25, 128, %s701_s6, [#allocation6]  }
 0x360   :  { %525 = dma.done.wait [#allocation6], 128  }
 0x361   :  { %526 = vsyncadd [#allocation6], 4294967168 }
 0x362   :  { %312 = vsyncpa [#allocation5], 1 }
 0x363   :  { %313 = vsyncpa [#allocation6], 1 }
 0x364   :  { %314 = vsyncmov [#allocation3] }
 0x367   :  { %s315_s11 = vpop.sfrf %314 }
 0x368   :  { %p329_p11 = scmp.ne.s32.totalorder %s315_s11, 0 }
 0x36a   :  { %319 = shalt.err (%p329_p11)  }
 0x36b   :  { %321 = vsyncmov [#allocation3 + $0x1] }
 0x36e   :  { %s322_s13 = vpop.sfrf %321 }
 0x36f   :  { %p330_p13 = scmp.ne.s32.totalorder %s322_s13, 0 }
 0x371   :  { %326 = shalt.err (%p330_p13)  }

</bundles_post_ra>
